<compile_context>
chip_gen: v7x
topology: tpu7x:2x2x1
jax: 0.10.0
libtpu: 0.0.40
codegen_flags: <defaults>
</compile_context>

<pallas_src>
import math
from functools import partial

import jax
import jax.numpy as jnp
from jax import lax
from jax.experimental import pallas as pl
from jax.experimental.pallas import tpu as pltpu


# ------------------------------ Pallas kernel -------------------------------

def _maxpool_same_kernel(x_ref, o_ref, pad_ref, hmax_ref, hmaxT_ref, *,
                         kh, kw, sh, sw, top, left, H, W, Ho, Wo):
    # x_ref:     (1, Cb, H,  W)   un-padded NCHW input tile (HBM layout kept)
    # o_ref:     (1, Cb, Ho, Wo)  pooled NCHW output tile
    # pad_ref:   (Cb, Hp, Wp)     zero-padded copy (pad value 0.0 participates)
    # hmax_ref:  (Cb, Ho, Wp)     max over the kh window rows
    # hmaxT_ref: (Cb, Wp, Ho)     same, with W moved to the sublane axis
    Cb, Hp, Wp = pad_ref.shape
    dt = pad_ref.dtype
    bottom = Hp - top - H
    right = Wp - left - W

    # ---- fused TF-"same" zero padding: zero only the border strips ---------
    if top:
        pad_ref[:, :top, :] = jnp.zeros((Cb, top, Wp), dt)
    if bottom:
        pad_ref[:, top + H:, :] = jnp.zeros((Cb, bottom, Wp), dt)
    if left:
        pad_ref[:, :, :left] = jnp.zeros((Cb, Hp, left), dt)
    if right:
        pad_ref[:, :, left + W:] = jnp.zeros((Cb, Hp, right), dt)
    pad_ref[:, top:top + H, left:left + W] = x_ref[0]

    # ---- stage 1: max over the kh rows of every window ----------------------
    # H sits on the sublane axis -> strided reads are pure addressing.
    # Accumulate in place into the declared scratch.
    hmax_ref[...] = pad_ref[:, pl.ds(0, Ho, stride=sh), :]
    for dy in range(1, kh):
        hmax_ref[...] = jnp.maximum(hmax_ref[...],
                                    pad_ref[:, pl.ds(dy, Ho, stride=sh), :])

    # ---- move W from the lane axis to the sublane axis (XLU, otherwise idle)
    hmaxT_ref[...] = jnp.swapaxes(hmax_ref[...], -1, -2)

    # ---- stage 2: max over the kw window columns (now sublane-strided), ----
    # accumulating straight into the output block.
    o_ref[0] = jnp.swapaxes(hmaxT_ref[:, pl.ds(0, Wo, stride=sw), :],
                            -1, -2).astype(o_ref.dtype)
    for dx in range(1, kw):
        o_ref[0] = jnp.maximum(
            o_ref[0],
            jnp.swapaxes(hmaxT_ref[:, pl.ds(dx, Wo, stride=sw), :],
                         -1, -2).astype(o_ref.dtype))


# ------------------------------ JAX wrapper ---------------------------------

def _pair(v):
    if isinstance(v, int):
        return (v, v)
    v = tuple(v)
    if len(v) == 1:
        return (v[0], v[0])
    return (v[0], v[1])


def _same_pad_amounts(H, W, kh, kw, sh, sw):
    Ho = math.ceil(H / sh)
    Wo = math.ceil(W / sw)
    extra_v = (Ho - 1) * sh - H + kh
    extra_h = (Wo - 1) * sw - W + kw
    top = extra_v // 2
    bottom = extra_v - top
    left = extra_h // 2
    right = extra_h - left
    return Ho, Wo, top, bottom, left, right


def _vreg_tile_bytes(rows, cols, itemsize):
    # (8, 128)-padded footprint of a 2D slice, per leading index.
    return (-(-rows // 8) * 8) * (-(-cols // 128) * 128) * itemsize


@partial(jax.jit, static_argnames=("kernel_size", "stride"))
def maxpool2d_static_same_padding(x_nchw, kernel_size=3, stride=2):
    """Matches MaxPool2dStaticSamePadding.forward. Input/output are NCHW."""
    kh, kw = _pair(kernel_size)
    sh, sw = _pair(stride)
    N, C, H, W = x_nchw.shape
    Ho, Wo, top, bottom, left, right = _same_pad_amounts(H, W, kh, kw, sh, sw)
    if top < 0 or left < 0:
        raise NotImplementedError("kernel_size must be >= stride")
    Hp = H + top + bottom
    Wp = W + left + right

    dt = x_nchw.dtype
    isz = jnp.dtype(dt).itemsize

    # Per-channel VMEM footprint: double-buffered in/out blocks + scratches.
    per_c = (2 * _vreg_tile_bytes(H, W, isz)
             + 2 * _vreg_tile_bytes(Ho, Wo, isz)
             + _vreg_tile_bytes(Hp, Wp, isz)
             + _vreg_tile_bytes(Ho, Wp, isz)
             + _vreg_tile_bytes(Wp, Ho, isz))

    # Channel tile: largest divisor of C that keeps the per-step footprint
    # under budget (Cb is a leading block dim, so no (8,128) constraint).
    budget = 12 << 20
    Cb = 1
    for cb in range(1, C + 1):
        if C % cb == 0 and cb * per_c <= budget:
            Cb = cb
    n_ct = C // Cb

    vmem_need = Cb * per_c
    vmem_limit = int(min(max(vmem_need * 3 // 2 + (1 << 20), 8 << 20), 96 << 20))

    kernel = partial(_maxpool_same_kernel, kh=kh, kw=kw, sh=sh, sw=sw,
                     top=top, left=left, H=H, W=W, Ho=Ho, Wo=Wo)

    cost = pl.CostEstimate(
        flops=N * C * Ho * Wo * kh * kw,               # compare ops
        transcendentals=0,
        bytes_accessed=(N * C * H * W + N * C * Ho * Wo) * isz)

    out = pl.pallas_call(
        kernel,
        out_shape=jax.ShapeDtypeStruct((N, C, Ho, Wo), dt),
        grid_spec=pltpu.PrefetchScalarGridSpec(
            num_scalar_prefetch=0,
            grid=(N, n_ct),
            in_specs=[
                pl.BlockSpec((1, Cb, H, W), lambda n, c: (n, c, 0, 0)),
            ],
            out_specs=pl.BlockSpec((1, Cb, Ho, Wo), lambda n, c: (n, c, 0, 0)),
            scratch_shapes=[
                pltpu.VMEM((Cb, Hp, Wp), dt),   # zero-padded tile
                pltpu.VMEM((Cb, Ho, Wp), dt),   # row-max intermediate
                pltpu.VMEM((Cb, Wp, Ho), dt),   # row-max, W on the sublane axis
            ],
        ),
        compiler_params=pltpu.CompilerParams(
            dimension_semantics=("parallel", "parallel"),
            vmem_limit_bytes=vmem_limit),
        cost_estimate=cost,
    )(x_nchw)

    return out


# ------------------------------ reference check -----------------------------

def _ref_forward(x_nchw, kernel_size=3, stride=2):
    kh, kw = _pair(kernel_size)
    sh, sw = _pair(stride)
    _, _, H, W = x_nchw.shape
    _, _, top, bottom, left, right = _same_pad_amounts(H, W, kh, kw, sh, sw)
    xp = jnp.pad(x_nchw, ((0, 0), (0, 0), (top, bottom), (left, right)))
    return lax.reduce_window(xp, -jnp.inf, lax.max,
                             (1, 1, kh, kw), (1, 1, sh, sw), "VALID")


if __name__ == "__main__":
    key = jax.random.PRNGKey(0)
    N, C, H, W = 2, 4, 16, 16
    kernel_size, stride = 3, 2                     # EfficientDet's usual (3, 2)

    x = jax.random.normal(key, (N, C, H, W), jnp.float32)   # NCHW, like PyTorch

    out = maxpool2d_static_same_padding(x, kernel_size=kernel_size,
                                        stride=stride)
    out = jax.block_until_ready(out)

    assert out.shape == (N, C, math.ceil(H / stride), math.ceil(W / stride)), \
        out.shape

    ref = _ref_forward(x, kernel_size, stride)
    assert jnp.allclose(out, ref, atol=0.0, rtol=0.0), float(
        jnp.max(jnp.abs(out - ref)))

    print("KERNEL_OK")
</pallas_src>

<mosaic_0001>
module attributes {stable_mosaic.version = 11 : i64} {
  func.func @_maxpool_same_kernel(%arg0: i32, %arg1: i32, %arg2: memref<1x4x16x16xf32, #tpu.memory_space<vmem>>, %arg3: memref<1x4x8x8xf32, #tpu.memory_space<vmem>>, %arg4: memref<4x17x17xf32, #tpu.memory_space<vmem>>, %arg5: memref<4x8x17xf32, #tpu.memory_space<vmem>>, %arg6: memref<4x17x8xf32, #tpu.memory_space<vmem>>) attributes {dimension_semantics = [#tpu.dimension_semantics<parallel>, #tpu.dimension_semantics<parallel>], iteration_bounds = array<i64: 2, 1>, scalar_prefetch = 0 : i64, scratch_operands = 3 : i64, tpu.core_type = #tpu.core_type<tc>, window_params = [{transform_indices = @transform_0, window_bounds = array<i64: 1, 4, 16, 16>}, {transform_indices = @transform_1, window_bounds = array<i64: 1, 4, 8, 8>}]} {
    %cst = arith.constant 0.000000e+00 : f32
    %0 = vector.broadcast %cst : f32 to vector<4x1x17xf32>
    %c0 = arith.constant 0 : index
    %c16 = arith.constant 16 : index
    %c0_0 = arith.constant 0 : index
    %1 = vector.load %arg4[%c0, %c16, %c0_0] : memref<4x17x17xf32, #tpu.memory_space<vmem>>, vector<4x1x17xf32>
    tpu.vector_store %arg4[%c0, %c16, %c0_0], %0 {strides = array<i32>} : memref<4x17x17xf32, #tpu.memory_space<vmem>>, vector<4x1x17xf32>,
    %cst_1 = arith.constant 0.000000e+00 : f32
    %2 = vector.broadcast %cst_1 : f32 to vector<4x17x1xf32>
    %c0_2 = arith.constant 0 : index
    %c0_3 = arith.constant 0 : index
    %c16_4 = arith.constant 16 : index
    %3 = vector.load %arg4[%c0_2, %c0_3, %c16_4] : memref<4x17x17xf32, #tpu.memory_space<vmem>>, vector<4x17x1xf32>
    tpu.vector_store %arg4[%c0_2, %c0_3, %c16_4], %2 {strides = array<i32>} : memref<4x17x17xf32, #tpu.memory_space<vmem>>, vector<4x17x1xf32>,
    %c0_5 = arith.constant 0 : index
    %c0_6 = arith.constant 0 : index
    %c0_7 = arith.constant 0 : index
    %c0_8 = arith.constant 0 : index
    %4 = vector.load %arg2[%c0_5, %c0_6, %c0_7, %c0_8] : memref<1x4x16x16xf32, #tpu.memory_space<vmem>>, vector<1x4x16x16xf32>
    %5 = vector.shape_cast %4 : vector<1x4x16x16xf32> to vector<4x16x16xf32>
    %c0_9 = arith.constant 0 : index
    %c0_10 = arith.constant 0 : index
    %c0_11 = arith.constant 0 : index
    %6 = vector.load %arg4[%c0_9, %c0_10, %c0_11] : memref<4x17x17xf32, #tpu.memory_space<vmem>>, vector<4x16x16xf32>
    tpu.vector_store %arg4[%c0_9, %c0_10, %c0_11], %5 {strides = array<i32>} : memref<4x17x17xf32, #tpu.memory_space<vmem>>, vector<4x16x16xf32>,
    %c0_12 = arith.constant 0 : index
    %c0_13 = arith.constant 0 : index
    %c0_14 = arith.constant 0 : index
    %7 = tpu.strided_load %arg4[%c0_12, %c0_13, %c0_14] {strides = array<i32: 1, 2, 1>} : memref<4x17x17xf32, #tpu.memory_space<vmem>>, vector<4x8x17xf32>
    %c0_15 = arith.constant 0 : index
    %c0_16 = arith.constant 0 : index
    %c0_17 = arith.constant 0 : index
    %8 = vector.load %arg5[%c0_15, %c0_16, %c0_17] : memref<4x8x17xf32, #tpu.memory_space<vmem>>, vector<4x8x17xf32>
    tpu.vector_store %arg5[%c0_15, %c0_16, %c0_17], %7 {strides = array<i32>} : memref<4x8x17xf32, #tpu.memory_space<vmem>>, vector<4x8x17xf32>,
    %c0_18 = arith.constant 0 : index
    %c0_19 = arith.constant 0 : index
    %c0_20 = arith.constant 0 : index
    %9 = vector.load %arg5[%c0_18, %c0_19, %c0_20] : memref<4x8x17xf32, #tpu.memory_space<vmem>>, vector<4x8x17xf32>
    %c0_21 = arith.constant 0 : index
    %c1 = arith.constant 1 : index
    %c0_22 = arith.constant 0 : index
    %10 = tpu.strided_load %arg4[%c0_21, %c1, %c0_22] {strides = array<i32: 1, 2, 1>} : memref<4x17x17xf32, #tpu.memory_space<vmem>>, vector<4x8x17xf32>
    %11 = arith.maximumf %9, %10 : vector<4x8x17xf32>
    %c0_23 = arith.constant 0 : index
    %c0_24 = arith.constant 0 : index
    %c0_25 = arith.constant 0 : index
    %12 = vector.load %arg5[%c0_23, %c0_24, %c0_25] : memref<4x8x17xf32, #tpu.memory_space<vmem>>, vector<4x8x17xf32>
    tpu.vector_store %arg5[%c0_23, %c0_24, %c0_25], %11 {strides = array<i32>} : memref<4x8x17xf32, #tpu.memory_space<vmem>>, vector<4x8x17xf32>,
    %c0_26 = arith.constant 0 : index
    %c0_27 = arith.constant 0 : index
    %c0_28 = arith.constant 0 : index
    %13 = vector.load %arg5[%c0_26, %c0_27, %c0_28] : memref<4x8x17xf32, #tpu.memory_space<vmem>>, vector<4x8x17xf32>
    %c0_29 = arith.constant 0 : index
    %c2 = arith.constant 2 : index
    %c0_30 = arith.constant 0 : index
    %14 = tpu.strided_load %arg4[%c0_29, %c2, %c0_30] {strides = array<i32: 1, 2, 1>} : memref<4x17x17xf32, #tpu.memory_space<vmem>>, vector<4x8x17xf32>
    %15 = arith.maximumf %13, %14 : vector<4x8x17xf32>
    %c0_31 = arith.constant 0 : index
    %c0_32 = arith.constant 0 : index
    %c0_33 = arith.constant 0 : index
    %16 = vector.load %arg5[%c0_31, %c0_32, %c0_33] : memref<4x8x17xf32, #tpu.memory_space<vmem>>, vector<4x8x17xf32>
    tpu.vector_store %arg5[%c0_31, %c0_32, %c0_33], %15 {strides = array<i32>} : memref<4x8x17xf32, #tpu.memory_space<vmem>>, vector<4x8x17xf32>,
    %c0_34 = arith.constant 0 : index
    %c0_35 = arith.constant 0 : index
    %c0_36 = arith.constant 0 : index
    %17 = vector.load %arg5[%c0_34, %c0_35, %c0_36] : memref<4x8x17xf32, #tpu.memory_space<vmem>>, vector<4x8x17xf32>
    %18 = tpu.transpose %17, [0, 2, 1] : vector<4x8x17xf32> -> vector<4x17x8xf32>
    %c0_37 = arith.constant 0 : index
    %c0_38 = arith.constant 0 : index
    %c0_39 = arith.constant 0 : index
    %19 = vector.load %arg6[%c0_37, %c0_38, %c0_39] : memref<4x17x8xf32, #tpu.memory_space<vmem>>, vector<4x17x8xf32>
    tpu.vector_store %arg6[%c0_37, %c0_38, %c0_39], %18 {strides = array<i32>} : memref<4x17x8xf32, #tpu.memory_space<vmem>>, vector<4x17x8xf32>,
    %c0_40 = arith.constant 0 : index
    %c0_41 = arith.constant 0 : index
    %c0_42 = arith.constant 0 : index
    %20 = tpu.strided_load %arg6[%c0_40, %c0_41, %c0_42] {strides = array<i32: 1, 2, 1>} : memref<4x17x8xf32, #tpu.memory_space<vmem>>, vector<4x8x8xf32>
    %21 = tpu.transpose %20, [0, 2, 1] : vector<4x8x8xf32> -> vector<4x8x8xf32>
    %c0_43 = arith.constant 0 : index
    %c0_44 = arith.constant 0 : index
    %c0_45 = arith.constant 0 : index
    %c0_46 = arith.constant 0 : index
    %22 = vector.load %arg3[%c0_43, %c0_44, %c0_45, %c0_46] : memref<1x4x8x8xf32, #tpu.memory_space<vmem>>, vector<1x4x8x8xf32>
    %23 = vector.shape_cast %22 : vector<1x4x8x8xf32> to vector<4x8x8xf32>
    %24 = vector.shape_cast %21 : vector<4x8x8xf32> to vector<1x4x8x8xf32>
    tpu.vector_store %arg3[%c0_43, %c0_44, %c0_45, %c0_46], %24 {strides = array<i32>} : memref<1x4x8x8xf32, #tpu.memory_space<vmem>>, vector<1x4x8x8xf32>,
    %c0_47 = arith.constant 0 : index
    %c0_48 = arith.constant 0 : index
    %c0_49 = arith.constant 0 : index
    %c0_50 = arith.constant 0 : index
    %25 = vector.load %arg3[%c0_47, %c0_48, %c0_49, %c0_50] : memref<1x4x8x8xf32, #tpu.memory_space<vmem>>, vector<1x4x8x8xf32>
    %26 = vector.shape_cast %25 : vector<1x4x8x8xf32> to vector<4x8x8xf32>
    %c0_51 = arith.constant 0 : index
    %c1_52 = arith.constant 1 : index
    %c0_53 = arith.constant 0 : index
    %27 = tpu.strided_load %arg6[%c0_51, %c1_52, %c0_53] {strides = array<i32: 1, 2, 1>} : memref<4x17x8xf32, #tpu.memory_space<vmem>>, vector<4x8x8xf32>
    %28 = tpu.transpose %27, [0, 2, 1] : vector<4x8x8xf32> -> vector<4x8x8xf32>
    %29 = arith.maximumf %26, %28 : vector<4x8x8xf32>
    %c0_54 = arith.constant 0 : index
    %c0_55 = arith.constant 0 : index
    %c0_56 = arith.constant 0 : index
    %c0_57 = arith.constant 0 : index
    %30 = vector.load %arg3[%c0_54, %c0_55, %c0_56, %c0_57] : memref<1x4x8x8xf32, #tpu.memory_space<vmem>>, vector<1x4x8x8xf32>
    %31 = vector.shape_cast %30 : vector<1x4x8x8xf32> to vector<4x8x8xf32>
    %32 = vector.shape_cast %29 : vector<4x8x8xf32> to vector<1x4x8x8xf32>
    tpu.vector_store %arg3[%c0_54, %c0_55, %c0_56, %c0_57], %32 {strides = array<i32>} : memref<1x4x8x8xf32, #tpu.memory_space<vmem>>, vector<1x4x8x8xf32>,
    %c0_58 = arith.constant 0 : index
    %c0_59 = arith.constant 0 : index
    %c0_60 = arith.constant 0 : index
    %c0_61 = arith.constant 0 : index
    %33 = vector.load %arg3[%c0_58, %c0_59, %c0_60, %c0_61] : memref<1x4x8x8xf32, #tpu.memory_space<vmem>>, vector<1x4x8x8xf32>
    %34 = vector.shape_cast %33 : vector<1x4x8x8xf32> to vector<4x8x8xf32>
    %c0_62 = arith.constant 0 : index
    %c2_63 = arith.constant 2 : index
    %c0_64 = arith.constant 0 : index
    %35 = tpu.strided_load %arg6[%c0_62, %c2_63, %c0_64] {strides = array<i32: 1, 2, 1>} : memref<4x17x8xf32, #tpu.memory_space<vmem>>, vector<4x8x8xf32>
    %36 = tpu.transpose %35, [0, 2, 1] : vector<4x8x8xf32> -> vector<4x8x8xf32>
    %37 = arith.maximumf %34, %36 : vector<4x8x8xf32>
    %c0_65 = arith.constant 0 : index
    %c0_66 = arith.constant 0 : index
    %c0_67 = arith.constant 0 : index
    %c0_68 = arith.constant 0 : index
    %38 = vector.load %arg3[%c0_65, %c0_66, %c0_67, %c0_68] : memref<1x4x8x8xf32, #tpu.memory_space<vmem>>, vector<1x4x8x8xf32>
    %39 = vector.shape_cast %38 : vector<1x4x8x8xf32> to vector<4x8x8xf32>
    %40 = vector.shape_cast %37 : vector<4x8x8xf32> to vector<1x4x8x8xf32>
    tpu.vector_store %arg3[%c0_65, %c0_66, %c0_67, %c0_68], %40 {strides = array<i32>} : memref<1x4x8x8xf32, #tpu.memory_space<vmem>>, vector<1x4x8x8xf32>,
    return
  }
  func.func @transform_0(%arg0: i32, %arg1: i32) -> (i32, i32, i32, i32) {
    %c0_i32 = arith.constant 0 : i32
    %c0_i32_0 = arith.constant 0 : i32
    %c0_i32_1 = arith.constant 0 : i32
    return %arg0, %arg1, %c0_i32, %c0_i32_0 : i32, i32, i32, i32
  }
  func.func @transform_1(%arg0: i32, %arg1: i32) -> (i32, i32, i32, i32) {
    %c0_i32 = arith.constant 0 : i32
    %c0_i32_0 = arith.constant 0 : i32
    %c0_i32_1 = arith.constant 0 : i32
    return %arg0, %arg1, %c0_i32, %c0_i32_0 : i32, i32, i32, i32
  }
}

</mosaic_0001>

<bundles_post_ra>
// kernel: maxpool2d_static_same_padding.1
= control target key start
LH: loop header
LB: loop body
LE: loop exit
PB: predicated region body
PF: predicated region fallthrough
CT: control target
= control target key end

     0   :  { %6 = vsyncpa [#allocation6], 0  ;;  %s1400_s0 = inlined_call_operand.hbm [shape: f32[2,4,16,16], index: 0, kind: input, shape index: {}]   ;;  %s1401_s1 = inlined_call_operand.hbm [shape: f32[2,4,8,8], index: 1, kind: output, shape index: {}]  }
   0x1   :  { %8 = vsyncpa [#allocation6 + $0x1], 0 }
   0x2   :  { %9 = vsyncpa [#allocation7], 0 }
   0x3   :  { %11 = vsyncpa [#allocation7 + $0x1], 0  ;;  %s1143_s6 = smov 0   ;;  %s1145_s7 = smov 0  }
   0x4   :  { %s1147_s8 = smov 0   ;;  %s1149_s9 = smov 0  }
   0x5   :  { %s1151_s10 = smov 0   ;;  %s1153_s11 = smov 0  }
   0x6 LB: > { %s928_s12 = sadd.s32 4294967295, %s1124_s11   ;;  %s929_s13 = sadd.s32 4294967294, %s1124_s11   ;;  %s1124_s11 = sphi %s1153_s11, %s17_s11   ;;  %s1120_s10 = sphi %s1151_s10, %s1416_s10   ;;  %s1116_s9 = sphi %s1149_s9, %s1415_s9   ;;  %s1112_s8 = sphi %s1147_s8, %s1414_s8   ;;  %s1108_s7 = sphi %s1145_s7, %s1413_s7   ;;  %s1104_s6 = sphi %s1143_s6, %s1412_s6  }
   0x7   : > { %s29_s14 = sadd.s32 1, %s1120_s10  ;;  %s38_s15 = sadd.s32 1, %s1112_s8 }
   0x8   : > { %p31_p0 = scmp.ge.s32.totalorder %s29_s14, 2  ;;  %p45_p1 = scmp.ne.s32.totalorder %s1112_s8, %s1108_s7 }
   0x9   : > { %p46_p2 = scmp.eq.s32.totalorder %s1124_s11, 0  ;;  %p51_p3 = scmp.ne.s32.totalorder %s1108_s7, %s1104_s6 }
   0xa   : > { %s1418_s14 = smov (%p31_p0, %s29_s14), 0  ;;  %p52_p5 = scmp.eq.s32.totalorder %s928_s12, 0 }
   0xb   : > { %p1184_p4 = por %p46_p2, %p45_p1  ;;  %s33_s17 = ssub.s32 %s1120_s10, %s1418_s14 }
   0xc   : > { %p77_p6 = scmp.eq.s32.totalorder %s928_s12, 1  ;;  %p36_p7 = scmp.eq.s32.totalorder %s33_s17, 0 }
   0xd   : > { %p1190_p8 = por %p52_p5, %p51_p3  ;;  %p83_p10 = scmp.eq.s32.totalorder %s929_s13, 1 }
   0xe   : > { %p1194_p9 = por %p77_p6, %p45_p1  ;;  %p957_p13 = scmp.lt.s32.totalorder %s1124_s11, 2 }
   0xf   : > { %s1199_s20 = scalar_select %p36_p7, %s1112_s8, %s38_s15  }
  0x10   : > { %s1405_s19 = scalar_select %p1194_p9, 1, 0 }
  0x11   : > { %p1201_p11 = por %p83_p10, %p51_p3  ;;  %s103_s22 = sand.u32 1, %s1112_s8  }
  0x12   : > { %s932_s23 = sshll.u32 %s103_s22, 6  ;;  %s943_s24 = sshll.u32 %s1120_s10, 10 }
  0x13   : > { %s1406_s21 = scalar_select %p1201_p11, 1, 0 }
  0x14   : > { %s1212_s27 = scalar_lea.hbm %s1400_s0, %s943_s24  ;;  %s107_s28 = scalar_lea.vmem [#allocation5], %s932_s23 }
  0x15   : > { %s117_s29 = sshll.u32 %s107_s28, 4  ;;  %p1218_p0 = pnand %p957_p13, %p1184_p4  ;;  %s1214_s29 = int_to_ptr.vmem [resolvable:$true] %s117_s29 }
  0x16   : > { %s1223_s2 = scalar_lea.sflag [#allocation6], %s103_s22  ;;  %s1012_s3 = scalar_lea.hbm %s1212_s27, 1024 }
  0x17   : > { %p1013_p2 = scmp.ne.s32.totalorder %s1212_s27, %s1012_s3  ;;  %p1014_p3 = pneg %p1218_p0 }
  0x18   : > { %s1017_s12 = scalar_lea.hbm %s1400_s0, 2048  ;;  %p1018_p4 = scmp.lt.u32.totalorder %s1212_s27, %s1400_s0 }
  0x19   : > { %p1015_p5 = pnand %p1014_p3, %p1013_p2  ;;  %p1019_p7 = scmp.lt.u32.totalorder %s1017_s12, %s1012_s3 }
  0x1a   : > { %p1021_p13 = scmp.lt.u32.totalorder %s1012_s3, %s1212_s27 }
  0x1b   : > { %p1016_p6 = pneg %p1015_p5  ;;  %p1020_p10 = por %p1019_p7, %p1018_p4 }
  0x1d   : > { %p1022_p12 = por %p1021_p13, %p1020_p10 }
  0x1f   : > { %p1023_p1 = pnand %p1022_p12, %p1016_p6 }
  0x21   : > { %1026 = shalt.err (!%p1023_p1)
}
  0x22   : > { %s1027_s16 = scalar_lea.vmem %s1214_s29, 1024  ;;  %s1126_s17 = smov [#allocation5]  }
  0x23   : > { %p1028_p2 = scmp.ne.s32.totalorder %s1214_s29, %s1027_s16  ;;  %s1032_s22 = sshll.u32 %s1126_s17, 4  ;;  %s1033_s22 = int_to_ptr.vmem [resolvable:$false] %s1032_s22 }
  0x24   : > { %s1034_s23 = scalar_lea.vmem %s1033_s22, 2048  ;;  %p1035_p9 = scmp.lt.s32.totalorder %s1214_s29, %s1033_s22 }
  0x25   : > { %p1030_p5 = pnand %p1028_p2, %p1014_p3  ;;  %p1036_p4 = scmp.lt.s32.totalorder %s1034_s23, %s1027_s16 }
  0x27   : > { %p1031_p11 = pneg %p1030_p5  ;;  %p1037_p7 = por %p1036_p4, %p1035_p9 }
  0x29   : > { %p1038_p10 = pnand %p1037_p7, %p1031_p11 }
  0x2b   : > { %1041 = shalt.err (!%p1038_p10)
}
  0x2c   : > { %s1127_s24 = smov 128   ;;  %s1128_s25 = smov 8  }
  0x2d   : > { %952 = dma.hbm_to_vmem [thread:$0]  (!%p1218_p0), %s1212_s27, 1024, %s1214_s29, %s1223_s2, %s1127_s24, %s1127_s24, %s1128_s25  }
  0x2e   : > { %p125_p12 = scmp.lt.s32.totalorder %s1124_s11, 3  ;;  %p1408_p1 = scmp.ge.s32.totalorder %s1124_s11, 1 }
  0x30   : > { %p126_p3 = pnand %p1408_p1, %p125_p12 }
  0x31   : > { %s1255_s26 = sand.u32 (!%p126_p3), 1, %s1108_s7  }
  0x32   : > { %129 = sbr.rel (%p126_p3) target bundleno = 425 (0x1a9), region = 24  ;;  %s936_s28 = sshll.u32 (!%p126_p3), %s1255_s26, 6 }
  0x33   : > { %s132_s3 = scalar_lea.sflag (!%p126_p3), [#allocation6], %s1255_s26  ;;  %s1259_s4 = scalar_lea.vmem (!%p126_p3), [#allocation5], %s936_s28 }
  0x39   : > { %1095 = dma.done.wait (%p1190_p8), %s132_s3, 1024  }
  0x3a   : > { %1097 = vsyncadd (%p1190_p8), %s132_s3, 4294966272  ;;  %vm156_vm0 = vcmask 131072   ;;  %vm161_vm1 = vcmask 138368   ;;  %vm164_vm2 = vcmask 131200   ;;  %v1129_v0 = vmov 0.0   ;;  %v179_v1 = vld [vmem:[%s1259_s4 + $0x20] sm:$0xff] }
  0x3b   : > { %159 = vst.msk [vmem:[#allocation2 + $0x40] sm:$0x1] %vm156_vm0, %v1129_v0  ;;  %157 = vst.msk [vmem:[#allocation2 + $0x10] sm:$0x1] %vm156_vm0, %v1129_v0  ;;  %vm183_vm3 = vcmask 130048   ;;  %v180_v2 = vld [vmem:[%s1259_s4 + $0x28] sm:$0xff] }
  0x3c   : > { %169 = vst.msk [vmem:[#allocation2 + $0x30] sm:$0xff] %vm161_vm1, %v1129_v0  ;;  %170 = vst.msk [vmem:[#allocation2 + $0x38] sm:$0xff] %vm161_vm1, %v1129_v0  ;;  %v175_v3 = vld [vmem:[%s1259_s4] sm:$0xff]  ;;  %v176_v4 = vld [vmem:[%s1259_s4 + $0x8] sm:$0xff]  ;;  %vm199_vm4 = vcmask 138240   ;;  %vm376_vm5 = vcmask 64512  }
  0x3d   : > { %158 = vst.msk [vmem:[#allocation2 + $0x28] sm:$0x1] %vm156_vm0, %v1129_v0  ;;  %160 = vst.msk [vmem:[#allocation2 + $0x58] sm:$0x1] %vm156_vm0, %v1129_v0  ;;  %v181_v5 = vld [vmem:[%s1259_s4 + $0x30] sm:$0xff]  ;;  %v182_v6 = vld [vmem:[%s1259_s4 + $0x38] sm:$0xff] }
  0x3e   : > { %162 = vst.msk [vmem:[#allocation2] sm:$0xff] %vm161_vm1, %v1129_v0  ;;  %163 = vst.msk [vmem:[#allocation2 + $0x8] sm:$0xff] %vm161_vm1, %v1129_v0  ;;  %v177_v7 = vld [vmem:[%s1259_s4 + $0x10] sm:$0xff]  ;;  %v178_v8 = vld [vmem:[%s1259_s4 + $0x18] sm:$0xff]  ;;  %vm379_vm6 = vcmask 57344   ;;  %s937_s18 = sshll.u32 %s1255_s26, 5 }
  0x3f   : > { %166 = vst.msk [vmem:[#allocation2 + $0x18] sm:$0xff] %vm161_vm1, %v1129_v0  ;;  %167 = vst.msk [vmem:[#allocation2 + $0x20] sm:$0xff] %vm161_vm1, %v1129_v0  ;;  %s1310_s27 = scalar_lea.vmem [#allocation8], %s937_s18  ;;  %s944_s29 = sshll.u32 %s1116_s9, 9 }
  0x40   : > { %172 = vst.msk [vmem:[#allocation2 + $0x48] sm:$0xff] %vm161_vm1, %v1129_v0  ;;  %173 = vst.msk [vmem:[#allocation2 + $0x50] sm:$0xff] %vm161_vm1, %v1129_v0  ;;  %s841_s30 = sshll.u32 %s1310_s27, 4  ;;  %s1347_s12 = scalar_lea.hbm %s1401_s1, %s944_s29  ;;  %s1349_s30 = int_to_ptr.vmem [resolvable:$true] %s841_s30 }
  0x41   : > { %171 = vst.msk [vmem:[#allocation2 + $0x40] sm:$0x1] %vm164_vm2, %v1129_v0  ;;  %165 = vst.msk [vmem:[#allocation2 + $0x10] sm:$0x1] %vm164_vm2, %v1129_v0  ;;  %s826_s13 = scalar_lea.sflag [#allocation7], %s1255_s26  ;;  %s1042_s9 = scalar_lea.vmem %s1349_s30, 512 }
  0x42   : > { %168 = vst.msk [vmem:[#allocation2 + $0x28] sm:$0x1] %vm164_vm2, %v1129_v0  ;;  %174 = vst.msk [vmem:[#allocation2 + $0x58] sm:$0x1] %vm164_vm2, %v1129_v0  ;;  %p1043_p8 = scmp.ne.s32.totalorder %s1349_s30, %s1042_s9  ;;  %p1409_p9 = scmp.ne.s32.totalorder %s1405_s19, 0 }
  0x43   : > { %188 = vst.msk [vmem:[#allocation2 + $0x30] sm:$0xff] %vm183_vm3, %v179_v1  ;;  %189 = vst.msk [vmem:[#allocation2 + $0x38] sm:$0xff] %vm183_vm3, %v180_v2  ;;  %s1130_s15 = smov [#allocation8]  }
  0x44   : > { %184 = vst.msk [vmem:[#allocation2] sm:$0xff] %vm183_vm3, %v175_v3  ;;  %185 = vst.msk [vmem:[#allocation2 + $0x8] sm:$0xff] %vm183_vm3, %v176_v4  ;;  %p1044_p11 = pnand %p1043_p8, %p1409_p9  ;;  %s1046_s16 = sshll.u32 %s1130_s15, 4  ;;  %s1047_s16 = int_to_ptr.vmem [resolvable:$false] %s1046_s16 }
  0x45   : > { %190 = vst.msk [vmem:[#allocation2 + $0x48] sm:$0xff] %vm183_vm3, %v181_v5  ;;  %191 = vst.msk [vmem:[#allocation2 + $0x50] sm:$0xff] %vm183_vm3, %v182_v6  ;;  %s1048_s17 = scalar_lea.vmem %s1047_s16, 1024  ;;  %p1049_p6 = scmp.lt.s32.totalorder %s1349_s30, %s1047_s16 }
  0x46   : > { %186 = vst.msk [vmem:[#allocation2 + $0x18] sm:$0xff] %vm183_vm3, %v177_v7  ;;  %187 = vst.msk [vmem:[#allocation2 + $0x20] sm:$0xff] %vm183_vm3, %v178_v8  ;;  %p1045_p0 = pneg %p1044_p11  ;;  %p1050_p13 = scmp.lt.s32.totalorder %s1048_s17, %s1042_s9 }
  0x48   : > { %p1051_p2 = por %p1050_p13, %p1049_p6 }
  0x4a   : > { %v196_v9 = vld [vmem:[#allocation2 + $0x30] ss:$2 sm:$0xff]  ;;  %v213_v13 = vld [vmem:[#allocation2 + $0x31] ss:$2 sm:$0xff]  ;;  %p1052_p5 = pnand %p1051_p2, %p1045_p0 }
  0x4b   : > { %202 = vst.msk [vmem:[#allocation3 + $0x10] sm:$0xff] %vm199_vm4, %v196_v9  ;;  %v192_v10 = vld [vmem:[#allocation2] ss:$2 sm:$0xff]  ;;  %v209_v14 = vld [vmem:[#allocation2 + $0x1] ss:$2 sm:$0xff] }
  0x4c   : > { %200 = vst.msk [vmem:[#allocation3] sm:$0xff] %vm199_vm4, %v192_v10  ;;  %v198_v11 = vld [vmem:[#allocation2 + $0x48] ss:$2 sm:$0xff]  ;;  %v215_v16 = vld [vmem:[#allocation2 + $0x49] ss:$2 sm:$0xff] }
  0x4d   : > { %203 = vst.msk [vmem:[#allocation3 + $0x18] sm:$0xff] %vm199_vm4, %v198_v11  ;;  %v194_v12 = vld [vmem:[#allocation2 + $0x18] ss:$2 sm:$0xff]  ;;  %v211_v19 = vld [vmem:[#allocation2 + $0x19] ss:$2 sm:$0xff] }
  0x4e   : > { %201 = vst.msk [vmem:[#allocation3 + $0x8] sm:$0xff] %vm199_vm4, %v194_v12  ;;  %v233_v25 = vld [vmem:[#allocation2 + $0x32] ss:$2 sm:$0xff]  ;;  %v229_v26 = vld [vmem:[#allocation2 + $0x2] ss:$2 sm:$0xff] }
  0x4f   : > { %v235_v28 = vld [vmem:[#allocation2 + $0x4a] ss:$2 sm:$0xff]  ;;  %v231_v31 = vld [vmem:[#allocation2 + $0x1a] ss:$2 sm:$0xff] }
  0x52   : > { %v206_v15 = vld [vmem:[#allocation3 + $0x10] sm:$0xff] }
  0x53   : > { %v218_v17 = vmax.f32 %v206_v15, %v213_v13  ;;  %v204_v18 = vld [vmem:[#allocation3] sm:$0xff] }
  0x54   : > { %v216_v20 = vmax.f32 %v204_v18, %v209_v14  ;;  %v207_v21 = vld [vmem:[#allocation3 + $0x18] sm:$0xff] }
  0x55   : > { %222 = vst.msk [vmem:[#allocation3 + $0x10] sm:$0xff] %vm199_vm4, %v218_v17  ;;  %v219_v22 = vmax.f32 %v207_v21, %v215_v16  ;;  %v205_v23 = vld [vmem:[#allocation3 + $0x8] sm:$0xff] }
  0x56   : > { %220 = vst.msk [vmem:[#allocation3] sm:$0xff] %vm199_vm4, %v216_v20  ;;  %v217_v24 = vmax.f32 %v205_v23, %v211_v19 }
  0x57   : > { %223 = vst.msk [vmem:[#allocation3 + $0x18] sm:$0xff] %vm199_vm4, %v219_v22 }
  0x58   : > { %221 = vst.msk [vmem:[#allocation3 + $0x8] sm:$0xff] %vm199_vm4, %v217_v24 }
  0x5c   : > { %v226_v27 = vld [vmem:[#allocation3 + $0x10] sm:$0xff] }
  0x5d   : > { %v238_v29 = vmax.f32 %v226_v27, %v233_v25  ;;  %v224_v30 = vld [vmem:[#allocation3] sm:$0xff] }
  0x5e   : > { %v236_v32 = vmax.f32 %v224_v30, %v229_v26  ;;  %v227_v33 = vld [vmem:[#allocation3 + $0x18] sm:$0xff] }
  0x5f   : > { %242 = vst.msk [vmem:[#allocation3 + $0x10] sm:$0xff] %vm199_vm4, %v238_v29  ;;  %v239_v34 = vmax.f32 %v227_v33, %v235_v28  ;;  %v225_v35 = vld [vmem:[#allocation3 + $0x8] sm:$0xff] }
  0x60   : > { %240 = vst.msk [vmem:[#allocation3] sm:$0xff] %vm199_vm4, %v236_v32  ;;  %v237_v36 = vmax.f32 %v225_v35, %v231_v31 }
  0x61   : > { %243 = vst.msk [vmem:[#allocation3 + $0x18] sm:$0xff] %vm199_vm4, %v239_v34 }
  0x62   : > { %241 = vst.msk [vmem:[#allocation3 + $0x8] sm:$0xff] %vm199_vm4, %v237_v36 }
  0x66   : > { %v246_v37 = vld [vmem:[#allocation3 + $0x10] sm:$0xff] }
  0x67   : > { %312 = vxpose.xlu1.b32.start.end [1/1] (short) (narrow) %v246_v37, 24  ;;  %v244_v38 = vld [vmem:[#allocation3] sm:$0xff] }
  0x68   : > { %248 = vxpose.xlu0.b32.start.end [1/1] (short) (narrow) %v244_v38, 24  ;;  %v247_v39 = vld [vmem:[#allocation3 + $0x18] sm:$0xff] }
  0x69   : > { %v245_v40 = vld [vmem:[#allocation3 + $0x8] sm:$0xff] }
  0x70   : > { %344 = vxpose.xlu1.b32.start.end [1/1] (short) (narrow) %v247_v39, 24 }
  0x71   : > { %280 = vxpose.xlu0.b32.start.end [1/1] (short) (narrow) %v245_v40, 24 }
  0xe7   : > { %v328_v41 = vpop.trf.xlu1 }
  0xe8   : > { %384 = vst.msk [vmem:[#allocation4 + $0x30] sm:$0xff] %vm376_vm5, %v328_v41  ;;  %v264_v42 = vpop.trf.xlu0 }
  0xe9   : > { %377 = vst.msk [vmem:[#allocation4] sm:$0xff] %vm376_vm5, %v264_v42 }
  0xeb   : > { %v329_v43 = vpop.trf.xlu1 }
  0xec   : > { %385 = vst.msk [vmem:[#allocation4 + $0x38] sm:$0xff] %vm376_vm5, %v329_v43  ;;  %v265_v44 = vpop.trf.xlu0 }
  0xed   : > { %378 = vst.msk [vmem:[#allocation4 + $0x8] sm:$0xff] %vm376_vm5, %v265_v44 }
  0xef   : > { %v330_v45 = vpop.trf.xlu1 }
  0xf0   : > { %386 = vst.msk [vmem:[#allocation4 + $0x40] sm:$0x1] %vm379_vm6, %v330_v45  ;;  %v266_v46 = vpop.trf.xlu0 }
  0xf1   : > { %380 = vst.msk [vmem:[#allocation4 + $0x10] sm:$0x1] %vm379_vm6, %v266_v46 }
  0xf3   : > { %v360_v47 = vpop.trf.xlu1  ;;  %v394_v52 = vld [vmem:[#allocation4 + $0x30] ss:$2 sm:$0xff]  ;;  %v538_v56 = vld [vmem:[#allocation4 + $0x31] ss:$2 sm:$0xff] }
  0xf4   : > { %387 = vst.msk [vmem:[#allocation4 + $0x48] sm:$0xff] %vm376_vm5, %v360_v47  ;;  %v296_v48 = vpop.trf.xlu0  ;;  %v390_v49 = vld [vmem:[#allocation4] ss:$2 sm:$0xff]  ;;  %v534_v55 = vld [vmem:[#allocation4 + $0x1] ss:$2 sm:$0xff] }
  0xf5   : > { %381 = vst.msk [vmem:[#allocation4 + $0x18] sm:$0xff] %vm376_vm5, %v296_v48  ;;  %397 = vxpose.xlu0.b32.start.end [1/1] (short) (narrow) %v390_v49, 8 }
  0xf7   : > { %v361_v50 = vpop.trf.xlu1  ;;  %v686_v60 = vld [vmem:[#allocation4 + $0x32] ss:$2 sm:$0xff] }
  0xf8   : > { %388 = vst.msk [vmem:[#allocation4 + $0x50] sm:$0xff] %vm376_vm5, %v361_v50  ;;  %v297_v51 = vpop.trf.xlu0  ;;  %v682_v58 = vld [vmem:[#allocation4 + $0x2] ss:$2 sm:$0xff] }
  0xf9   : > { %382 = vst.msk [vmem:[#allocation4 + $0x20] sm:$0xff] %vm376_vm5, %v297_v51  ;;  %461 = vxpose.xlu0.b32.start.end [1/1] (short) (narrow) %v394_v52, 8 }
  0xfb   : > { %v362_v53 = vpop.trf.xlu1 }
  0xfc   : > { %389 = vst.msk [vmem:[#allocation4 + $0x58] sm:$0x1] %vm379_vm6, %v362_v53  ;;  %v298_v54 = vpop.trf.xlu0 }
  0xfd   : > { %383 = vst.msk [vmem:[#allocation4 + $0x28] sm:$0x1] %vm379_vm6, %v298_v54  ;;  %541 = vxpose.xlu0.b32.start.end [1/1] (short) (narrow) %v534_v55, 8 }
  0xff   : > { %v396_v59 = vld [vmem:[#allocation4 + $0x48] ss:$2 sm:$0xff]  ;;  %v540_v62 = vld [vmem:[#allocation4 + $0x49] ss:$2 sm:$0xff] }
 0x100   : > { %v392_v57 = vld [vmem:[#allocation4 + $0x18] ss:$2 sm:$0xff]  ;;  %v536_v61 = vld [vmem:[#allocation4 + $0x19] ss:$2 sm:$0xff] }
 0x101   : > { %605 = vxpose.xlu0.b32.start.end [1/1] (short) (narrow) %v538_v56, 8  ;;  %429 = vxpose.xlu1.b32.start.end [1/1] (short) (narrow) %v392_v57, 8 }
 0x103   : > { %v688_v0 = vld [vmem:[#allocation4 + $0x4a] ss:$2 sm:$0xff] }
 0x104   : > { %v684_v63 = vld [vmem:[#allocation4 + $0x1a] ss:$2 sm:$0xff] }
 0x105   : > { %689 = vxpose.xlu0.b32.start.end [1/1] (short) (narrow) %v682_v58, 8  ;;  %493 = vxpose.xlu1.b32.start.end [1/1] (short) (narrow) %v396_v59, 8 }
 0x109   : > { %753 = vxpose.xlu0.b32.start.end [1/1] (short) (narrow) %v686_v60, 8  ;;  %573 = vxpose.xlu1.b32.start.end [1/1] (short) (narrow) %v536_v61, 8 }
 0x10d   : > { %637 = vxpose.xlu1.b32.start.end [1/1] (short) (narrow) %v540_v62, 8 }
 0x111   : > { %721 = vxpose.xlu1.b32.start.end [1/1] (short) (narrow) %v684_v63, 8 }
 0x115   : > { %785 = vxpose.xlu1.b32.start.end [1/1] (short) (narrow) %v688_v0, 8 }
 0x175   : > { %v413_v1 = vpop.trf.xlu0 }
 0x176   : > { %525 = vst.msk [vmem:[%s1310_s27] sm:$0xff] %vm376_vm5, %v413_v1 }
 0x179   : > { %v477_v2 = vpop.trf.xlu0 }
 0x17a   : > { %527 = vst.msk [vmem:[%s1310_s27 + $0x10] sm:$0xff] %vm376_vm5, %v477_v2 }
 0x17d   : > { %v529_v3 = vld [vmem:[%s1310_s27] sm:$0xff]  ;;  %v557_v4 = vpop.trf.xlu0 }
 0x17e   : > { %v669_v5 = vmax.f32 %v529_v3, %v557_v4 }
 0x180   : > { %673 = vst.msk [vmem:[%s1310_s27] sm:$0xff] %vm376_vm5, %v669_v5 }
 0x181   : > { %v445_v6 = vpop.trf.xlu1  ;;  %v531_v7 = vld [vmem:[%s1310_s27 + $0x10] sm:$0xff]  ;;  %v621_v8 = vpop.trf.xlu0 }
 0x182   : > { %526 = vst.msk [vmem:[%s1310_s27 + $0x8] sm:$0xff] %vm376_vm5, %v445_v6  ;;  %v671_v9 = vmax.f32 %v531_v7, %v621_v8 }
 0x184   : > { %675 = vst.msk [vmem:[%s1310_s27 + $0x10] sm:$0xff] %vm376_vm5, %v671_v9 }
 0x185   : > { %v509_v10 = vpop.trf.xlu1  ;;  %v705_v11 = vpop.trf.xlu0 }
 0x186   : > { %528 = vst.msk [vmem:[%s1310_s27 + $0x18] sm:$0xff] %vm376_vm5, %v509_v10 }
 0x187   : > { %v677_v12 = vld [vmem:[%s1310_s27] sm:$0xff] }
 0x188   : > { %v817_v13 = vmax.f32 %v677_v12, %v705_v11 }
 0x189   : > { %v530_v14 = vld [vmem:[%s1310_s27 + $0x8] sm:$0xff]  ;;  %v589_v15 = vpop.trf.xlu1  ;;  %v769_v16 = vpop.trf.xlu0 }
 0x18a   : > { %v670_v17 = vmax.f32 %v530_v14, %v589_v15  ;;  %821 = vst.msk [vmem:[%s1310_s27] sm:$0xff] %vm376_vm5, %v817_v13 }
 0x18b   : > { %v679_v18 = vld [vmem:[%s1310_s27 + $0x10] sm:$0xff] }
 0x18c   : > { %674 = vst.msk [vmem:[%s1310_s27 + $0x8] sm:$0xff] %vm376_vm5, %v670_v17  ;;  %v819_v19 = vmax.f32 %v679_v18, %v769_v16 }
 0x18d   : > { %v532_v20 = vld [vmem:[%s1310_s27 + $0x18] sm:$0xff]  ;;  %v653_v21 = vpop.trf.xlu1 }
 0x18e   : > { %v672_v22 = vmax.f32 %v532_v20, %v653_v21  ;;  %823 = vst.msk [vmem:[%s1310_s27 + $0x10] sm:$0xff] %vm376_vm5, %v819_v19 }
 0x190   : > { %676 = vst.msk [vmem:[%s1310_s27 + $0x18] sm:$0xff] %vm376_vm5, %v672_v22 }
 0x191   : > { %v737_v23 = vpop.trf.xlu1 }
 0x193   : > { %v678_v24 = vld [vmem:[%s1310_s27 + $0x8] sm:$0xff] }
 0x194   : > { %v818_v25 = vmax.f32 %v678_v24, %v737_v23 }
 0x195   : > { %v801_v26 = vpop.trf.xlu1 }
 0x196   : > { %822 = vst.msk [vmem:[%s1310_s27 + $0x8] sm:$0xff] %vm376_vm5, %v818_v25 }
 0x197   : > { %v680_v27 = vld [vmem:[%s1310_s27 + $0x18] sm:$0xff] }
 0x198   : > { %v820_v28 = vmax.f32 %v680_v27, %v801_v26 }
 0x19a   : > { %824 = vst.msk [vmem:[%s1310_s27 + $0x18] sm:$0xff] %vm376_vm5, %v820_v28 }
 0x19b   : > { %1055 = shalt.err (!%p1052_p5)
}
 0x19c   : > { %s1056_s22 = scalar_lea.hbm %s1347_s12, 512  ;;  %s1060_s25 = scalar_lea.hbm %s1401_s1, 1024 }
 0x19d   : > { %p1057_p4 = scmp.ne.s32.totalorder %s1347_s12, %s1056_s22  ;;  %p1061_p12 = scmp.lt.u32.totalorder %s1347_s12, %s1401_s1 }
 0x19e   : > { %p1062_p1 = scmp.lt.u32.totalorder %s1060_s25, %s1056_s22  ;;  %p1064_p8 = scmp.lt.u32.totalorder %s1056_s22, %s1347_s12 }
 0x19f   : > { %p1058_p7 = pnand %p1057_p4, %p1409_p9 }
 0x1a0   : > { %p1063_p3 = por %p1062_p1, %p1061_p12 }
 0x1a1   : > { %p1059_p10 = pneg %p1058_p7 }
 0x1a2   : > { %p1065_p11 = por %p1064_p8, %p1063_p3 }
 0x1a4   : > { %p1066_p0 = pnand %p1065_p11, %p1059_p10 }
 0x1a6   : > { %1069 = shalt.err (!%p1066_p0)
}
 0x1a7   : > { %s1131_s4 = smov 128   ;;  %s1132_s18 = smov 8  }
 0x1a8   : > { %947 = dma.vmem_to_hbm [thread:$0]  (%p1409_p9), %s1349_s30, 512, %s1347_s12, %s826_s13, %s1131_s4, %s1131_s4, %s1132_s18  }
 0x1a9 PF: > { %s856_s27 = sand.u32 1, %s1104_s6   ;;  %p1410_p6 = scmp.ne.s32.totalorder %s1406_s21, 0 }
 0x1aa   : > { %p1411_p13 = scmp.ge.s32.totalorder %s1124_s11, 2  ;;  %s857_s29 = scalar_lea.sflag [#allocation7], %s856_s27 }
 0x1ac   : > { %p954_p2 = pnand %p1411_p13, %p1410_p6 }
 0x1ae   : > { %1099 = dma.done.wait (!%p954_p2), %s857_s29, 512  }
 0x1af   : > { %1101 = vsyncadd (!%p954_p2), %s857_s29, 4294966784  ;;  %s17_s11 = sadd.s32 1, %s1124_s11   ;;  %s1412_s6 = smov %s1108_s7 }
 0x1b0   : > { %p14_p5 = scmp.ge.s32.totalorder %s17_s11, 4   ;;  %s1413_s7 = smov %s1112_s8 }
 0x1b1   : > { %s1414_s8 = smov %s1199_s20  ;;  %s1415_s9 = smov %s1120_s10 }
 0x1b2   : > { %s1416_s10 = smov %s1418_s14  ;;  %16 = sbr.rel (!%p14_p5) target bundleno = 6 (0x6), region = 91 }
 0x1b9   :  { %862 = vsyncpa [#allocation6], 1 }
 0x1ba   :  { %864 = vsyncpa [#allocation6 + $0x1], 1 }
 0x1bb   :  { %865 = vsyncpa [#allocation7], 1 }
 0x1bc   :  { %867 = vsyncpa [#allocation7 + $0x1], 1 }

</bundles_post_ra>
